<compile_context>
chip_gen: v7x
topology: tpu7x:2x2x1
jax: 0.10.0
libtpu: 0.0.40
codegen_flags: <defaults>
</compile_context>

<pallas_src>
import functools

import jax
import jax.numpy as jnp
from jax import lax
from jax.experimental import pallas as pl
from jax.experimental.pallas import tpu as pltpu

EPS = 1e-5
NEG_SLOPE = 0.2
LANES = 128
SUBLANES = 8


def _round_up(x, m):
    return (x + m - 1) // m * m


def _conv_in_lrelu_kernel(x_ref, w_ref, o_ref, acc_ref, *,
                          h_out, w_out, a_max, b_max, n_phase):
    """One (batch, stride-phase) grid step.

    x_ref  : (1, 1, hp2, wp2p, c_in_p)            bf16 phase slab
    w_ref  : (n_phase, a_max, b_max, c_in_p, cp)  bf16 grid-resident weights
    o_ref  : (1, p_flat, cp)                      bf16, written only at the last phase
    acc_ref: (p_flat, cp) f32                     accumulator across the phase axis
    """
    ph = pl.program_id(1)
    p_flat = h_out * w_out

    x = x_ref[0, 0]                                        # (hp2, wp2p, c_in_p) bf16
    c_in_p = x.shape[-1]

    # Local accumulation over this phase's taps -> one accumulator RMW per phase.
    y_phase = None
    for a in range(a_max):
        for b in range(b_max):
            # Slice the bf16 input (cheap, half the bytes of the old f32 slice) and
            # matmul only the h_out*w_out rows that are actually needed.
            x_tap = x[a:a + h_out, b:b + w_out, :].reshape(p_flat, c_in_p)
            w_tap = w_ref[ph, a, b]                        # (c_in_p, cp) bf16
            contrib = jnp.dot(x_tap, w_tap, preferred_element_type=jnp.float32)
            y_phase = contrib if y_phase is None else y_phase + contrib

    def _norm_act_store(acc):
        # InstanceNorm2d(affine=False): biased variance, single pass over acc.
        inv_p = 1.0 / p_flat
        s1 = jnp.sum(acc, axis=0, keepdims=True)
        s2 = jnp.sum(acc * acc, axis=0, keepdims=True)
        mean = s1 * inv_p
        var = jnp.maximum(s2 * inv_p - mean * mean, 0.0)
        y = (acc - mean) * lax.rsqrt(var + EPS)
        y = jnp.maximum(y, NEG_SLOPE * y)                  # LeakyReLU(0.2)
        o_ref[0] = y.astype(o_ref.dtype)

    if n_phase == 1:
        _norm_act_store(y_phase)
    else:
        @pl.when(ph == 0)
        def _init():
            acc_ref[...] = y_phase

        @pl.when(jnp.logical_and(ph > 0, ph < n_phase - 1))
        def _accum():
            acc_ref[...] += y_phase

        @pl.when(ph == n_phase - 1)
        def _finalize():
            # Skip the last acc write-back: combine with the local value directly.
            _norm_act_store(acc_ref[...] + y_phase)


@functools.partial(jax.jit, static_argnames=("kernel_size", "stride", "padding"))
def conv2d_block(x, weight, bias=None, *, kernel_size=4, stride=2, padding=1):
    """Forward of Conv2DBlock (conv -> instance norm (affine=False) -> leaky relu 0.2).

    x:      [N, C_in, H, W]        (NCHW, like PyTorch)
    weight: [C_out, C_in, KH, KW]  (PyTorch conv weight layout)
    bias:   [C_out]  -- intentionally unused: a per-channel constant cancels exactly
                        under InstanceNorm2d's mean subtraction (affine=False).
    returns [N, C_out, H_out, W_out]
    """
    n, c_in, h, w = x.shape
    c_out = weight.shape[0]
    kh = kw = kernel_size
    s = stride
    assert kh % s == 0, "stride-phase decomposition assumes kernel_size % stride == 0"

    h_out = (h + 2 * padding - kh) // s + 1
    w_out = (w + 2 * padding - kw) // s + 1
    a_max, b_max = kh // s, kw // s                 # taps per phase along H / W
    n_phase = s * s                                 # stride phases (reduction grid axis)
    hp2 = h_out + a_max - 1                         # rows needed per phase slab
    wp2 = w_out + b_max - 1                         # cols needed per phase slab
    wp2p = _round_up(wp2, SUBLANES)
    c_in_p = _round_up(c_in, SUBLANES)              # pad contraction dim
    cp = _round_up(c_out, LANES)                    # lane-dense / MXU-wide output channels
    p_flat = h_out * w_out

    # ---- input: NCHW -> padded NHWC -> stride-phase slabs (input-sized, no im2col) ----
    x_nhwc = jnp.transpose(x, (0, 2, 3, 1))
    x_pad = jnp.pad(x_nhwc, ((0, 0), (padding, padding), (padding, padding), (0, 0)))
    x_pad = x_pad[:, :s * hp2, :s * wp2, :]
    x_ph = x_pad.reshape(n, hp2, s, wp2, s, c_in)
    x_ph = jnp.transpose(x_ph, (0, 2, 4, 1, 3, 5))          # [n, rh, rw, hp2, wp2, c_in]
    x_ph = jnp.pad(x_ph, ((0, 0),) * 4 + ((0, wp2p - wp2), (0, c_in_p - c_in)))
    x_ph = x_ph.reshape(n, n_phase, hp2, wp2p, c_in_p).astype(jnp.bfloat16)

    # ---- weight: [c_out, c_in, kh, kw] -> per-phase taps [n_phase, a, b, c_in_p, cp] ----
    w_t = jnp.transpose(weight, (2, 3, 1, 0))               # [kh, kw, c_in, c_out]
    w_t = jnp.pad(w_t, ((0, 0), (0, 0), (0, c_in_p - c_in), (0, cp - c_out)))
    w_ph = w_t.reshape(a_max, s, b_max, s, c_in_p, cp)      # (a, rh, b, rw, ...)
    w_ph = jnp.transpose(w_ph, (1, 3, 0, 2, 4, 5))          # (rh, rw, a, b, ...)
    w_ph = w_ph.reshape(n_phase, a_max, b_max, c_in_p, cp).astype(jnp.bfloat16)

    kernel = functools.partial(_conv_in_lrelu_kernel, h_out=h_out, w_out=w_out,
                               a_max=a_max, b_max=b_max, n_phase=n_phase)

    # ---- VMEM budget: count the real buffers + temporaries, clamp to device ceiling ----
    bytes_w = 2 * w_ph.size * 2                      # resident weight block (allow 2x buffering)
    bytes_x = 2 * hp2 * wp2p * c_in_p * 2            # double-buffered bf16 input slab
    bytes_o = 2 * p_flat * cp * 2                    # double-buffered bf16 output block
    bytes_acc = p_flat * cp * 4                      # f32 accumulator scratch
    bytes_tmp = 2 * p_flat * cp * 4 + 4 * p_flat * c_in_p * 2   # y_phase / finalize / tap slices
    vmem_needed = bytes_w + bytes_x + bytes_o + bytes_acc + bytes_tmp
    try:
        vmem_cap = int(0.75 * pltpu.get_tpu_info().vmem_capacity_bytes)
    except Exception:
        vmem_cap = 96 * 1024 * 1024                  # conservative for 128 MiB parts (v5e/v6e)
    vmem_limit = int(min(max(vmem_needed + (4 << 20), 16 << 20), vmem_cap))

    flops = 2 * n * n_phase * a_max * b_max * p_flat * c_in_p * cp
    bytes_accessed = x_ph.size * 2 + w_ph.size * 2 + n * p_flat * cp * 2

    out = pl.pallas_call(
        kernel,
        out_shape=jax.ShapeDtypeStruct((n, p_flat, cp), jnp.bfloat16),
        grid_spec=pltpu.PrefetchScalarGridSpec(
            num_scalar_prefetch=0,
            grid=(n, n_phase),                              # phase = reduction, last axis
            in_specs=[
                pl.BlockSpec((1, 1, hp2, wp2p, c_in_p),
                             lambda b, ph: (b, ph, 0, 0, 0)),
                # Grid-resident weights: constant block index -> single DMA.
                pl.BlockSpec((n_phase, a_max, b_max, c_in_p, cp),
                             lambda b, ph: (0, 0, 0, 0, 0)),
            ],
            out_specs=pl.BlockSpec((1, p_flat, cp), lambda b, ph: (b, 0, 0)),
            scratch_shapes=[pltpu.VMEM((p_flat, cp), jnp.float32)],
        ),
        compiler_params=pltpu.CompilerParams(
            dimension_semantics=("parallel", "arbitrary"),
            vmem_limit_bytes=vmem_limit,
        ),
        cost_estimate=pl.CostEstimate(flops=flops, transcendentals=n * cp,
                                      bytes_accessed=bytes_accessed),
    )(x_ph, w_ph)                                           # [n, p_flat, cp] bf16

    out = out.reshape(n, h_out, w_out, cp)[..., :c_out]     # drop channel padding
    return jnp.transpose(out, (0, 3, 1, 2)).astype(x.dtype) # NCHW


def _reference(x, weight, bias, *, kernel_size=4, stride=2, padding=1):
    """Pure-JAX reference (conv -> instance norm -> leaky relu), bias included."""
    y = lax.conv_general_dilated(
        x, weight,
        window_strides=(stride, stride),
        padding=((padding, padding), (padding, padding)),
        dimension_numbers=("NCHW", "OIHW", "NCHW"),
    ) + bias.reshape(1, -1, 1, 1)
    mean = jnp.mean(y, axis=(2, 3), keepdims=True)
    var = jnp.mean((y - mean) ** 2, axis=(2, 3), keepdims=True)
    y = (y - mean) * lax.rsqrt(var + EPS)
    return jnp.where(y >= 0, y, NEG_SLOPE * y)


if __name__ == "__main__":
    key = jax.random.PRNGKey(0)
    k_x, k_w, k_b = jax.random.split(key, 3)

    N, C_IN, H, W = 2, 4, 16, 16
    C_OUT, KSZ, STRIDE, PAD = 8, 4, 2, 1

    x = jax.random.normal(k_x, (N, C_IN, H, W), dtype=jnp.float32)
    fan_in = C_IN * KSZ * KSZ
    bound = 1.0 / (fan_in ** 0.5)
    weight = jax.random.uniform(k_w, (C_OUT, C_IN, KSZ, KSZ),
                                minval=-bound, maxval=bound, dtype=jnp.float32)
    bias = jax.random.uniform(k_b, (C_OUT,),
                              minval=-bound, maxval=bound, dtype=jnp.float32)

    out = conv2d_block(x, weight, bias, kernel_size=KSZ, stride=STRIDE, padding=PAD)
    out = jax.block_until_ready(out)

    ref = _reference(x, weight, bias, kernel_size=KSZ, stride=STRIDE, padding=PAD)
    assert out.shape == (N, C_OUT, H // 2, W // 2), out.shape
    # bf16 matmul inputs + bf16 kernel output (f32 accumulation) -> bf16-scale tolerance.
    assert jnp.allclose(out, ref, atol=3e-2, rtol=3e-2), "mismatch vs reference"

    print("KERNEL_OK")
</pallas_src>

<mosaic_0001>
module attributes {stable_mosaic.version = 11 : i64} {
  func.func @_conv_in_lrelu_kernel(%arg0: i32, %arg1: i32, %arg2: memref<1x1x9x16x8xbf16, #tpu.memory_space<vmem>>, %arg3: memref<4x2x2x8x128xbf16, #tpu.memory_space<vmem>>, %arg4: memref<1x64x128xbf16, #tpu.memory_space<vmem>>, %arg5: memref<64x128xf32, #tpu.memory_space<vmem>>) attributes {dimension_semantics = [#tpu.dimension_semantics<parallel>, #tpu.dimension_semantics<arbitrary>], iteration_bounds = array<i64: 2, 4>, scalar_prefetch = 0 : i64, scratch_operands = 1 : i64, tpu.core_type = #tpu.core_type<tc>, window_params = [{transform_indices = @transform_0, window_bounds = array<i64: 1, 1, 9, 16, 8>}, {pipeline_mode = #tpu.pipeline_mode<synchronous>, transform_indices = @transform_1, window_bounds = array<i64: 4, 2, 2, 8, 128>}, {transform_indices = @transform_2, window_bounds = array<i64: 1, 64, 128>}]} {
    %c0 = arith.constant 0 : index
    %c0_0 = arith.constant 0 : index
    %c0_1 = arith.constant 0 : index
    %c0_2 = arith.constant 0 : index
    %c0_3 = arith.constant 0 : index
    %0 = vector.load %arg2[%c0, %c0_0, %c0_1, %c0_2, %c0_3] : memref<1x1x9x16x8xbf16, #tpu.memory_space<vmem>>, vector<1x1x9x16x8xbf16>
    %1 = vector.shape_cast %0 : vector<1x1x9x16x8xbf16> to vector<9x16x8xbf16>
    %2 = vector.extract_strided_slice %1 {offsets = [0, 0, 0], sizes = [8, 8, 8], strides = [1, 1, 1]} : vector<9x16x8xbf16> to vector<8x8x8xbf16>
    %3 = vector.shape_cast %2 : vector<8x8x8xbf16> to vector<64x8xbf16>
    %4 = arith.index_cast %arg1 : i32 to index
    %c0_4 = arith.constant 0 : index
    %c0_5 = arith.constant 0 : index
    %c0_6 = arith.constant 0 : index
    %c0_7 = arith.constant 0 : index
    %5 = vector.load %arg3[%4, %c0_4, %c0_5, %c0_6, %c0_7] : memref<4x2x2x8x128xbf16, #tpu.memory_space<vmem>>, vector<1x1x1x8x128xbf16>
    %6 = vector.shape_cast %5 : vector<1x1x1x8x128xbf16> to vector<8x128xbf16>
    %cst = arith.constant dense<0.000000e+00> : vector<64x128xf32>
    %7 = tpu.matmul %3, %6, %cst {dimension_numbers = #tpu.dot_dimension_numbers<[1], [0], [0], [1], [0, 0, 1, 1], [], []>} : vector<64x8xbf16>, vector<8x128xbf16>, vector<64x128xf32> -> vector<64x128xf32>
    %8 = vector.extract_strided_slice %1 {offsets = [0, 1, 0], sizes = [8, 8, 8], strides = [1, 1, 1]} : vector<9x16x8xbf16> to vector<8x8x8xbf16>
    %9 = vector.shape_cast %8 : vector<8x8x8xbf16> to vector<64x8xbf16>
    %10 = arith.index_cast %arg1 : i32 to index
    %c0_8 = arith.constant 0 : index
    %c1 = arith.constant 1 : index
    %c0_9 = arith.constant 0 : index
    %c0_10 = arith.constant 0 : index
    %11 = vector.load %arg3[%10, %c0_8, %c1, %c0_9, %c0_10] : memref<4x2x2x8x128xbf16, #tpu.memory_space<vmem>>, vector<1x1x1x8x128xbf16>
    %12 = vector.shape_cast %11 : vector<1x1x1x8x128xbf16> to vector<8x128xbf16>
    %cst_11 = arith.constant dense<0.000000e+00> : vector<64x128xf32>
    %13 = tpu.matmul %9, %12, %cst_11 {dimension_numbers = #tpu.dot_dimension_numbers<[1], [0], [0], [1], [0, 0, 1, 1], [], []>} : vector<64x8xbf16>, vector<8x128xbf16>, vector<64x128xf32> -> vector<64x128xf32>
    %14 = arith.addf %7, %13 : vector<64x128xf32>
    %15 = vector.extract_strided_slice %1 {offsets = [1, 0, 0], sizes = [8, 8, 8], strides = [1, 1, 1]} : vector<9x16x8xbf16> to vector<8x8x8xbf16>
    %16 = vector.shape_cast %15 : vector<8x8x8xbf16> to vector<64x8xbf16>
    %17 = arith.index_cast %arg1 : i32 to index
    %c1_12 = arith.constant 1 : index
    %c0_13 = arith.constant 0 : index
    %c0_14 = arith.constant 0 : index
    %c0_15 = arith.constant 0 : index
    %18 = vector.load %arg3[%17, %c1_12, %c0_13, %c0_14, %c0_15] : memref<4x2x2x8x128xbf16, #tpu.memory_space<vmem>>, vector<1x1x1x8x128xbf16>
    %19 = vector.shape_cast %18 : vector<1x1x1x8x128xbf16> to vector<8x128xbf16>
    %cst_16 = arith.constant dense<0.000000e+00> : vector<64x128xf32>
    %20 = tpu.matmul %16, %19, %cst_16 {dimension_numbers = #tpu.dot_dimension_numbers<[1], [0], [0], [1], [0, 0, 1, 1], [], []>} : vector<64x8xbf16>, vector<8x128xbf16>, vector<64x128xf32> -> vector<64x128xf32>
    %21 = arith.addf %14, %20 : vector<64x128xf32>
    %22 = vector.extract_strided_slice %1 {offsets = [1, 1, 0], sizes = [8, 8, 8], strides = [1, 1, 1]} : vector<9x16x8xbf16> to vector<8x8x8xbf16>
    %23 = vector.shape_cast %22 : vector<8x8x8xbf16> to vector<64x8xbf16>
    %24 = arith.index_cast %arg1 : i32 to index
    %c1_17 = arith.constant 1 : index
    %c1_18 = arith.constant 1 : index
    %c0_19 = arith.constant 0 : index
    %c0_20 = arith.constant 0 : index
    %25 = vector.load %arg3[%24, %c1_17, %c1_18, %c0_19, %c0_20] : memref<4x2x2x8x128xbf16, #tpu.memory_space<vmem>>, vector<1x1x1x8x128xbf16>
    %26 = vector.shape_cast %25 : vector<1x1x1x8x128xbf16> to vector<8x128xbf16>
    %cst_21 = arith.constant dense<0.000000e+00> : vector<64x128xf32>
    %27 = tpu.matmul %23, %26, %cst_21 {dimension_numbers = #tpu.dot_dimension_numbers<[1], [0], [0], [1], [0, 0, 1, 1], [], []>} : vector<64x8xbf16>, vector<8x128xbf16>, vector<64x128xf32> -> vector<64x128xf32>
    %28 = arith.addf %21, %27 : vector<64x128xf32>
    %c0_i32 = arith.constant 0 : i32
    %29 = arith.cmpi eq, %arg1, %c0_i32 : i32
    %30 = arith.extui %29 : i1 to i32
    %c0_i32_22 = arith.constant 0 : i32
    %31 = arith.cmpi ne, %30, %c0_i32_22 : i32
    scf.if %31 {
      %c0_27 = arith.constant 0 : index
      %c0_28 = arith.constant 0 : index
      %40 = vector.load %arg5[%c0_27, %c0_28] : memref<64x128xf32, #tpu.memory_space<vmem>>, vector<64x128xf32>
      tpu.vector_store %arg5[%c0_27, %c0_28], %28 {strides = array<i32>} : memref<64x128xf32, #tpu.memory_space<vmem>>, vector<64x128xf32>,
    } else {
    }
    %c0_i32_23 = arith.constant 0 : i32
    %32 = arith.cmpi sgt, %arg1, %c0_i32_23 : i32
    %c3_i32 = arith.constant 3 : i32
    %33 = arith.cmpi slt, %arg1, %c3_i32 : i32
    %34 = arith.andi %32, %33 : i1
    %35 = arith.extui %34 : i1 to i32
    %c0_i32_24 = arith.constant 0 : i32
    %36 = arith.cmpi ne, %35, %c0_i32_24 : i32
    scf.if %36 {
      %c0_27 = arith.constant 0 : index
      %c0_28 = arith.constant 0 : index
      %40 = vector.load %arg5[%c0_27, %c0_28] : memref<64x128xf32, #tpu.memory_space<vmem>>, vector<64x128xf32>
      %41 = arith.addf %40, %28 : vector<64x128xf32>
      %c0_29 = arith.constant 0 : index
      %c0_30 = arith.constant 0 : index
      %42 = vector.load %arg5[%c0_29, %c0_30] : memref<64x128xf32, #tpu.memory_space<vmem>>, vector<64x128xf32>
      tpu.vector_store %arg5[%c0_29, %c0_30], %41 {strides = array<i32>} : memref<64x128xf32, #tpu.memory_space<vmem>>, vector<64x128xf32>,
    } else {
    }
    %c3_i32_25 = arith.constant 3 : i32
    %37 = arith.cmpi eq, %arg1, %c3_i32_25 : i32
    %38 = arith.extui %37 : i1 to i32
    %c0_i32_26 = arith.constant 0 : i32
    %39 = arith.cmpi ne, %38, %c0_i32_26 : i32
    scf.if %39 {
      %c0_27 = arith.constant 0 : index
      %c0_28 = arith.constant 0 : index
      %40 = vector.load %arg5[%c0_27, %c0_28] : memref<64x128xf32, #tpu.memory_space<vmem>>, vector<64x128xf32>
      %41 = arith.addf %40, %28 : vector<64x128xf32>
      %cst_29 = arith.constant dense<0.000000e+00> : vector<128xf32>
      %42 = vector.multi_reduction <add>, %41, %cst_29 [0] : vector<64x128xf32> to vector<128xf32>
      %43 = vector.shape_cast %42 : vector<128xf32> to vector<1x128xf32>
      %44 = arith.mulf %41, %41 : vector<64x128xf32>
      %cst_30 = arith.constant dense<0.000000e+00> : vector<128xf32>
      %45 = vector.multi_reduction <add>, %44, %cst_30 [0] : vector<64x128xf32> to vector<128xf32>
      %46 = vector.shape_cast %45 : vector<128xf32> to vector<1x128xf32>
      %cst_31 = arith.constant 1.562500e-02 : f32
      %47 = vector.broadcast %cst_31 : f32 to vector<1x128xf32>
      %48 = arith.mulf %43, %47 : vector<1x128xf32>
      %cst_32 = arith.constant 1.562500e-02 : f32
      %49 = vector.broadcast %cst_32 : f32 to vector<1x128xf32>
      %50 = arith.mulf %46, %49 : vector<1x128xf32>
      %51 = arith.mulf %48, %48 : vector<1x128xf32>
      %52 = arith.subf %50, %51 : vector<1x128xf32>
      %cst_33 = arith.constant 0.000000e+00 : f32
      %53 = vector.broadcast %cst_33 : f32 to vector<1x128xf32>
      %54 = arith.maximumf %52, %53 : vector<1x128xf32>
      %55 = vector.broadcast %48 : vector<1x128xf32> to vector<64x128xf32>
      %56 = arith.subf %41, %55 : vector<64x128xf32>
      %cst_34 = arith.constant 9.99999974E-6 : f32
      %57 = vector.broadcast %cst_34 : f32 to vector<1x128xf32>
      %58 = arith.addf %54, %57 : vector<1x128xf32>
      %59 = math.rsqrt %58 : vector<1x128xf32>
      %60 = vector.broadcast %59 : vector<1x128xf32> to vector<64x128xf32>
      %61 = arith.mulf %56, %60 : vector<64x128xf32>
      %cst_35 = arith.constant 2.000000e-01 : f32
      %62 = vector.broadcast %cst_35 : f32 to vector<64x128xf32>
      %63 = arith.mulf %62, %61 : vector<64x128xf32>
      %64 = arith.maximumf %61, %63 : vector<64x128xf32>
      %65 = arith.truncf %64 : vector<64x128xf32> to vector<64x128xbf16>
      %c0_36 = arith.constant 0 : index
      %c0_37 = arith.constant 0 : index
      %c0_38 = arith.constant 0 : index
      %66 = vector.load %arg4[%c0_36, %c0_37, %c0_38] : memref<1x64x128xbf16, #tpu.memory_space<vmem>>, vector<1x64x128xbf16>
      %67 = vector.shape_cast %66 : vector<1x64x128xbf16> to vector<64x128xbf16>
      %68 = vector.shape_cast %65 : vector<64x128xbf16> to vector<1x64x128xbf16>
      tpu.vector_store %arg4[%c0_36, %c0_37, %c0_38], %68 {strides = array<i32>} : memref<1x64x128xbf16, #tpu.memory_space<vmem>>, vector<1x64x128xbf16>,
    } else {
    }
    return
  }
  func.func @transform_0(%arg0: i32, %arg1: i32) -> (i32, i32, i32, i32, i32) {
    %c0_i32 = arith.constant 0 : i32
    %c0_i32_0 = arith.constant 0 : i32
    %c0_i32_1 = arith.constant 0 : i32
    %c0_i32_2 = arith.constant 0 : i32
    return %arg0, %arg1, %c0_i32, %c0_i32_0, %c0_i32_1 : i32, i32, i32, i32, i32
  }
  func.func @transform_1(%arg0: i32, %arg1: i32) -> (i32, i32, i32, i32, i32) {
    %c0_i32 = arith.constant 0 : i32
    %c0_i32_0 = arith.constant 0 : i32
    %c0_i32_1 = arith.constant 0 : i32
    %c0_i32_2 = arith.constant 0 : i32
    %c0_i32_3 = arith.constant 0 : i32
    %c0_i32_4 = arith.constant 0 : i32
    return %c0_i32, %c0_i32_0, %c0_i32_1, %c0_i32_2, %c0_i32_3 : i32, i32, i32, i32, i32
  }
  func.func @transform_2(%arg0: i32, %arg1: i32) -> (i32, i32, i32) {
    %c0_i32 = arith.constant 0 : i32
    %c0_i32_0 = arith.constant 0 : i32
    %c0_i32_1 = arith.constant 0 : i32
    return %arg0, %c0_i32, %c0_i32_0 : i32, i32, i32
  }
}

</mosaic_0001>

<bundles_post_ra>
// kernel: conv2d_block.1
= control target key start
LH: loop header
LB: loop body
LE: loop exit
PB: predicated region body
PF: predicated region fallthrough
CT: control target
= control target key end

     0   :  { %s1273_s9 = smov 0   ;;  %s1275_s10 = smov 0   ;;  %s1482_s0 = inlined_call_operand.vmem [shape: bf16[2,4,9,16,8], index: 0, kind: input, shape index: {}]   ;;  %s1483_s1 = inlined_call_operand.vmem [shape: bf16[4,2,2,8,128], index: 1, kind: input, shape index: {}]   ;;  %s1484_s2 = inlined_call_operand.vmem [shape: bf16[2,64,128], index: 2, kind: output, shape index: {}]  }
   0x1   :  { %s1277_s11 = smov 0   ;;  %s1279_s12 = smov 0  }
   0x2   :  { %s1281_s13 = smov 0  }
   0x3 LB: > { %s21_s14 = sadd.s32 1, %s1248_s11  ;;  %s24_s15 = sadd.s32 1, %s1252_s12  ;;  %s1256_s13 = sphi %s1281_s13, %s12_s13   ;;  %s1252_s12 = sphi %s1279_s12, %s1490_s12   ;;  %s1248_s11 = sphi %s1277_s11, %s1489_s11   ;;  %s1244_s10 = sphi %s1275_s10, %s1488_s10   ;;  %s1240_s9 = sphi %s1273_s9, %s1487_s9  }
   0x4   : > { %p22_p0 = scmp.ge.s32.totalorder %s21_s14, 4  ;;  %p983_p1 = scmp.ge.s32.totalorder %s1256_s13, 1 }
   0x5   : > { %p130_p2 = scmp.lt.s32.totalorder %s1256_s13, 9 }
   0x6   : > { %s1492_s14 = smov (%p22_p0, %s21_s14), 0  ;;  %s1494_s15 = smov (!%p22_p0, %s24_s15), %s1252_s12 }
   0x7   : > { %p131_p3 = pnand %p983_p1, %p130_p2  ;;  %p26_p4 = scmp.ge.s32.totalorder %s1494_s15, 2 }
   0x8   : > { %s1043_s16 = sshll.u32 (!%p131_p3), %s1240_s9, 4  ;;  %vm337_vm0 = vcmask (!%p131_p3), 1043456   ;;  %p156_p5 = scmp.lt.s32.totalorder (!%p131_p3), %s1244_s10, 1  ;;  %vm324_vm1 = vcmask (!%p131_p3), 64512   ;;  %vm193_vm2 = vsmask.f32 (!%p131_p3), 3328 }
   0x9   : > { %s1496_s15 = smov (%p26_p4, %s1494_s15), 0  ;;  %134 = sbr.rel (%p131_p3) target bundleno = 361 (0x169), region = 28 }
   0xa   : > { %s191_s19 = scalar_lea.vmem (!%p131_p3), %s1483_s1, %s1043_s16  ;;  %p158_p6 = scmp.lt.s32.totalorder (!%p131_p3), %s1240_s9, 3  ;;  %vm194_vm3 = vsmask.f32 (!%p131_p3), 7440 }
   0xb   : > { %v1010_v0 = vld [vmem:[%s191_s19 + $0x8] sm:$0xf] (!%p131_p3)  ;;  %v991_v1 = vld [vmem:[%s191_s19 + $0x4] sm:$0xf] (!%p131_p3)  ;;  %v192_v4 = vld [vmem:[%s191_s19] sm:$0xf] (!%p131_p3) }
   0xc   : > { %1164 = vmatprep.subr.msk.bf16.mxu0 (!%p131_p3), %vm337_vm0, %v1010_v0  ;;  %v529_v2 = vsel (!%p131_p3), %vm337_vm0, %v1010_v0, 0  ;;  %1162 = vmatprep.subr.msk.bf16.mxu1 (!%p131_p3), %vm337_vm0, %v991_v1  ;;  %v339_v3 = vsel (!%p131_p3), %vm337_vm0, %v991_v1, 0  ;;  %v1021_v5 = vld [vmem:[%s191_s19 + $0xc] sm:$0xf] (!%p131_p3)  ;;  %v1344_v12 = vsel (!%p131_p3), %vm337_vm0, %v192_v4, 0  ;;  %vm1382_vm4 = vmor (!%p131_p3), %vm193_vm2, %vm194_vm3  ;;  %p1030_p7 = scmp.ne.s32.totalorder (!%p131_p3), %s1240_s9, 0 }
   0xd   : > { %1119 = vmatpush3.bf16.msra.mxu0 (!%p131_p3), %v529_v2  ;;  %1099 = vmatpush3.bf16.msra.mxu1 (!%p131_p3), %v339_v3  ;;  %v640_v13 = vsel (!%p131_p3), %vm337_vm0, %v1021_v5, 0 }
   0xe   : > { %1163 = vmatprep.subr.msk.bf16.mxu1 (!%p131_p3), %vm337_vm0, %v192_v4  ;;  %1165 = vmatprep.subr.msk.bf16.mxu0 (!%p131_p3), %vm337_vm0, %v1021_v5 }
  0x10   : > { %s1498_s10 = smov (!%p156_p5, %s1244_s10), 1 }
  0x11   : > { %s159_s20 = scalar_select %p158_p6, %s1240_s9, 3 }
  0x12   : > { %s1167_s21 = smul.u32 72, %s1498_s10  ;;  %s1042_s22 = sshll.u32 %s1498_s10, 5 }
  0x13   : > { %s1166_s23 = smul.u32 18, %s159_s20  ;;  %s1320_s26 = scalar_lea.vmem %s1484_s2, %s1042_s22 }
  0x15   : > { %s162_s27 = sadd.s32 %s1167_s21, %s1166_s23 }
  0x16   : > { %s984_s28 = sshll.u32 %s162_s27, 2 }
  0x17   : > { %s1327_s3 = scalar_lea.vmem %s1482_s0, %s984_s28 }
  0x18   : > { %v1330_v6 = vld [vmem:[%s1327_s3 + $0x8] sm:$0xf]  ;;  %v1333_v7 = vld [vmem:[%s1327_s3 + $0x10] sm:$0xf]  ;;  %v1336_v8 = vld [vmem:[%s1327_s3 + $0x18] sm:$0xf] }
  0x19   : > { %v225_v9 = vshrl.u32 %v1333_v7, 16  ;;  %v228_v10 = vshll.u32 %v1333_v7, 16  ;;  %v1341_v11 = vld [vmem:[%s1327_s3 + $0x20] sm:$0xf]  ;;  %v211_v14 = vshrl.u32 %v1330_v6, 16  ;;  %v214_v15 = vshll.u32 %v1330_v6, 16 }
  0x1a   : > { %v1011_v16 = vcombine.low %v1330_v6, %v1333_v7  ;;  %v1352_v17 = vld [vmem:[%s1327_s3 + $0x28] sm:$0xf]  ;;  %v1355_v18 = vld [vmem:[%s1327_s3 + $0x30] sm:$0xf]  ;;  %v253_v21 = vshrl.u32 %v1341_v11, 16  ;;  %v1012_v22 = vcombine.low %v1336_v8, %v1341_v11  ;;  %v256_v24 = vshll.u32 %v1341_v11, 16 }
  0x1b   : > { %v227_v19 = vrot.slane %v225_v9, 4  ;;  %v230_v20 = vrot.slane %v228_v10, 5  ;;  %v1361_v23 = vld [vmem:[%s1327_s3] sm:$0xf]  ;;  %v267_v25 = vshrl.u32 %v1352_v17, 16  ;;  %v270_v26 = vshll.u32 %v1352_v17, 16 }
  0x1c   : > { %1120 = vmatprep.mubr.msk.bf16.mxu0 %vm324_vm1, %v1011_v16  ;;  %v1013_v27 = vcombine.low %v1352_v17, %v1355_v18  ;;  %v172_v28 = vld [vmem:[%s1327_s3 + $0x4] sm:$0xf]  ;;  %v281_v29 = vshrl.u32 %v1355_v18, 16  ;;  %v284_v30 = vshll.u32 %v1355_v18, 16  ;;  %v174_v31 = vld [vmem:[%s1327_s3 + $0xc] sm:$0xf]  ;;  %v1002_v44 = vcombine.low %v1341_v11, %v1352_v17 }
  0x1d   : > { %1121 = vmatmul.mubr.msk.bf16.vlgmr.msra.gmra.mrb[0].mxu0 %vm324_vm1, %v1012_v22  ;;  %v176_v32 = vld [vmem:[%s1327_s3 + $0x14] sm:$0xf]  ;;  %v231_v33 = vor.u32 %v230_v20, %v227_v19  ;;  %v197_v34 = vshrl.u32 %v1361_v23, 16  ;;  %v200_v35 = vshll.u32 %v1361_v23, 16  ;;  %v206_v36 = vshll.u32 %v172_v28, 16 }
  0x1e   : > { %1124 = vmatprep.mubr.msk.bf16.mxu0 %vm324_vm1, %v1013_v27  ;;  %v213_v37 = vrot.slane %v211_v14, 4  ;;  %1129 = vmatpush3.bf16.msra.mxu0 %v640_v13  ;;  %v178_v38 = vld [vmem:[%s1327_s3 + $0x1c] sm:$0xf]  ;;  %v216_v39 = vrot.slane %v214_v15, 5  ;;  %v220_v40 = vshll.u32 %v174_v31, 16  ;;  %v234_v42 = vshll.u32 %v176_v32, 16 }
  0x1f   : > { %v232_v41 = vrot.slane %v231_v33, 4  ;;  %v180_v43 = vld [vmem:[%s1327_s3 + $0x24] sm:$0xf]  ;;  %v199_v45 = vrot.slane %v197_v34, 4  ;;  %v202_v46 = vrot.slane %v200_v35, 5  ;;  %v208_v47 = vrot.slane %v206_v36, 5 }
  0x20   : > { %v239_v48 = vshrl.u32 %v1336_v8, 16  ;;  %v217_v49 = vor.u32 %v216_v39, %v213_v37  ;;  %v222_v50 = vrot.slane %v220_v40, 5  ;;  %v236_v51 = vrot.slane %v234_v42, 5  ;;  %v1389_v53 = vld [vmem:[%s1327_s3 + $0x38] sm:$0xf] }
  0x21   : > { %v242_v52 = vshll.u32 %v1336_v8, 16  ;;  %v203_v54 = vor.u32 %v202_v46, %v199_v45  ;;  %v248_v56 = vshll.u32 %v178_v38, 16  ;;  %v255_v57 = vrot.slane %v253_v21, 4  ;;  %v187_v62 = vld [vmem:[%s1327_s3 + $0x40] sm:$0xf] }
  0x22   : > { %v241_v55 = vrot.slane %v239_v48, 4  ;;  %v218_v58 = vrot.slane %v217_v49, 4  ;;  %v237_v59 = vsel %vm1382_vm4, %v232_v41, %v236_v51  ;;  %v258_v61 = vrot.slane %v256_v24, 5  ;;  %v182_v10 = vld [vmem:[%s1327_s3 + $0x2c] sm:$0xf] }
  0x23   : > { %v244_v60 = vrot.slane %v242_v52, 5  ;;  %v204_v63 = vrot.slane %v203_v54, 4  ;;  %v250_v0 = vrot.slane %v248_v56, 5  ;;  %v262_v1 = vshll.u32 %v180_v43, 16  ;;  %v184_v32 = vld [vmem:[%s1327_s3 + $0x34] sm:$0xf] }
  0x24   : > { %v295_v2 = vshrl.u32 %v1389_v53, 16  ;;  %v223_v3 = vsel %vm1382_vm4, %v218_v58, %v222_v50  ;;  %v259_v5 = vor.u32 %v258_v61, %v255_v57  ;;  %v298_v9 = vshll.u32 %v1389_v53, 16  ;;  %v186_v36 = vld [vmem:[%s1327_s3 + $0x3c] sm:$0xf]  ;;  %v188_v40 = vld [vmem:[%s1327_s3 + $0x44] sm:$0xf] }
  0x25   : > { %v245_v4 = vor.u32 %v244_v60, %v241_v55  ;;  %v209_v13 = vsel %vm1382_vm4, %v204_v63, %v208_v47  ;;  %v264_v14 = vrot.slane %v262_v1, 5  ;;  %v1022_v15 = vcombine.low %v223_v3, %v237_v59 }
  0x26   : > { %v1014_v16 = vcombine.low %v1389_v53, %v187_v62  ;;  %v260_v20 = vrot.slane %v259_v5, 4  ;;  %v992_v21 = vcombine.low %v209_v13, %v223_v3  ;;  %v605_v22 = vshrl.u32 %v187_v62, 16 }
  0x27   : > { %v246_v19 = vrot.slane %v245_v4, 4  ;;  %v608_v24 = vshll.u32 %v187_v62, 16  ;;  %v269_v27 = vrot.slane %v267_v25, 4  ;;  %v272_v28 = vrot.slane %v270_v26, 5 }
  0x28   : > { %1125 = vmatmul.mubr.msk.bf16.gmra.mrb[4].mxu0 %vm324_vm1, %v1014_v16  ;;  %v276_v31 = vshll.u32 %v182_v10, 16  ;;  %v265_v34 = vsel %vm1382_vm4, %v260_v20, %v264_v14  ;;  %1100 = vmatprep.mubr.msk.bf16.mxu1 %vm324_vm1, %v992_v21  ;;  %v607_v35 = vrot.slane %v605_v22, 4  ;;  %v283_v37 = vrot.slane %v281_v29, 4 }
  0x29   : > { %v251_v33 = vsel %vm1382_vm4, %v246_v19, %v250_v0  ;;  %1130 = vmatprep.mubr.msk.bf16.mxu0 %vm324_vm1, %v1022_v15  ;;  %v610_v26 = vrot.slane %v608_v24, 5  ;;  %v273_v39 = vor.u32 %v272_v28, %v269_v27  ;;  %v286_v42 = vrot.slane %v284_v30, 5 }
  0x2a   : > { %v993_v38 = vcombine.low %v237_v59, %v251_v33  ;;  %v1023_v25 = vcombine.low %v251_v33, %v265_v34  ;;  %v278_v41 = vrot.slane %v276_v31, 5  ;;  %v290_v43 = vshll.u32 %v184_v32, 16 }
  0x2b   : > { %v297_v45 = vrot.slane %v295_v2, 4  ;;  %v274_v46 = vrot.slane %v273_v39, 4  ;;  %v300_v47 = vrot.slane %v298_v9, 5  ;;  %v304_v48 = vshll.u32 %v186_v36, 16 }
  0x2c   : > { %1101 = vmatmul.mubr.msk.bf16.vlgmr.msra.gmra.mrb[0].mxu1 %vm324_vm1, %v993_v38  ;;  %v611_v49 = vor.u32 %v610_v26, %v607_v35  ;;  %v287_v29 = vor.u32 %v286_v42, %v283_v37  ;;  %v292_v50 = vrot.slane %v290_v43, 5  ;;  %v614_v51 = vshll.u32 %v188_v40, 16 }
  0x2d   : > { %1109 = vmatpush3.bf16.msra.mxu1 %v1344_v12  ;;  %v279_v52 = vsel %vm1382_vm4, %v274_v46, %v278_v41  ;;  %v301_v54 = vor.u32 %v300_v47, %v297_v45  ;;  %v306_v55 = vrot.slane %v304_v48, 5  ;;  %v1000_v63 = vcombine.low %v1361_v23, %v1330_v6 }
  0x2e   : > { %v612_v56 = vrot.slane %v611_v49, 4  ;;  %v994_v30 = vcombine.low %v265_v34, %v279_v52  ;;  %v288_v57 = vrot.slane %v287_v29, 4  ;;  %v616_v58 = vrot.slane %v614_v51, 5 }
  0x2f   : > { %v302_v59 = vrot.slane %v301_v54, 4  ;;  %v1001_v2 = vcombine.low %v1333_v7, %v1336_v8  ;;  %v1003_v6 = vcombine.low %v1355_v18, %v1389_v53 }
  0x30   : > { %1131 = vmatmul.mubr.msk.bf16.vlgmr.msra.gmra.mrb[0].mxu0 %vm324_vm1, %v1023_v25  ;;  %1104 = vmatprep.mubr.msk.bf16.mxu1 %vm324_vm1, %v994_v30  ;;  %v293_v12 = vsel %vm1382_vm4, %v288_v57, %v292_v50  ;;  %v617_v60 = vsel %vm1382_vm4, %v612_v56, %v616_v58 }
  0x31   : > { %v307_v61 = vsel %vm1382_vm4, %v302_v59, %v306_v55  ;;  %v1024_v62 = vcombine.low %v279_v52, %v293_v12 }
  0x32   : > { %v995_v0 = vcombine.low %v293_v12, %v307_v61  ;;  %v1025_v1 = vcombine.low %v307_v61, %v617_v60 }
  0x33   : > { %1134 = vmatprep.mubr.msk.bf16.mxu0 %vm324_vm1, %v1024_v62 }
  0x34   : > { %1105 = vmatmul.mubr.msk.bf16.gmra.mrb[4].mxu1 %vm324_vm1, %v995_v0 }
  0x35   : > { %1110 = vmatprep.mubr.msk.bf16.mxu1 %vm324_vm1, %v1000_v63 }
  0x38   : > { %1135 = vmatmul.mubr.msk.bf16.gmra.mrb[4].mxu0 %vm324_vm1, %v1025_v1 }
  0x3c   : > { %1111 = vmatmul.mubr.msk.bf16.vlgmr.msra.gmra.mrb[0].mxu1 %vm324_vm1, %v1001_v2 }
  0x3d   : > { %1114 = vmatprep.mubr.msk.bf16.mxu1 %vm324_vm1, %v1002_v44 }
  0x44   : > { %1115 = vmatmul.mubr.msk.bf16.gmra.mrb[4].mxu1 %vm324_vm1, %v1003_v6 }
 0x103   : > { %v1132_v23 = vpop.f32.mrb[0].mxu0 }
 0x104   : > { %v676_v3 = vpop.f32.mrb[1].mxu0 }
 0x105   : > { %v1133_v4 = vpop.f32.mrb[2].mxu0 }
 0x106   : > { %v679_v5 = vpop.f32.mrb[3].mxu0 }
 0x10b   : > { %v1136_v9 = vpop.f32.mrb[4].mxu0 }
 0x10c   : > { %v692_v10 = vpop.f32.mrb[5].mxu0 }
 0x10d   : > { %v1137_v13 = vpop.f32.mrb[6].mxu0 }
 0x10e   : > { %v695_v7 = vpop.f32.mrb[7].mxu0 }
 0x10f   : > { %v1112_v8 = vpop.f32.mrb[0].mxu1 }
 0x110   : > { %v1443_v14 = vadd.f32 %v1132_v23, %v1112_v8  ;;  %v475_v11 = vpop.f32.mrb[1].mxu1 }
 0x111   : > { %v1139_v17 = vadd.f32 %v676_v3, %v475_v11  ;;  %v1113_v15 = vpop.f32.mrb[2].mxu1 }
 0x112   : > { %v1140_v16 = vadd.f32 %v1133_v4, %v1113_v15  ;;  %v478_v19 = vpop.f32.mrb[3].mxu1  ;;  %721 = vst [vmem:[#allocation2 + $0x10] sm:$0xff] (!%p1030_p7), %v1443_v14 }
 0x113   : > { %v1141_v20 = vadd.f32 %v679_v5, %v478_v19  ;;  %719 = vst [vmem:[#allocation2] sm:$0xff] (!%p1030_p7), %v1139_v17 }
 0x114   : > { %722 = vst [vmem:[#allocation2 + $0x18] sm:$0xff] (!%p1030_p7), %v1140_v16 }
 0x115   : > { %718 = sbr.rel (%p1030_p7) target bundleno = 286 (0x11e), region = 32  ;;  %720 = vst [vmem:[#allocation2 + $0x8] sm:$0xff] (!%p1030_p7), %v1141_v20 }
 0x117   : > { %v1116_v18 = vpop.f32.mrb[4].mxu1 }
 0x118   : > { %v1445_v53 = vadd.f32 %v1136_v9, %v1116_v18  ;;  %v491_v21 = vpop.f32.mrb[5].mxu1 }
 0x119   : > { %v1143_v22 = vadd.f32 %v692_v10, %v491_v21  ;;  %v1117_v24 = vpop.f32.mrb[6].mxu1 }
 0x11a   : > { %v1447_v27 = vadd.f32 %v1137_v13, %v1117_v24  ;;  %v494_v28 = vpop.f32.mrb[7].mxu1  ;;  %725 = vst [vmem:[#allocation2 + $0x30] sm:$0xff] (!%p1030_p7), %v1445_v53 }
 0x11b   : > { %v1145_v31 = vadd.f32 %v695_v7, %v494_v28  ;;  %723 = vst [vmem:[#allocation2 + $0x20] sm:$0xff] (!%p1030_p7), %v1143_v22 }
 0x11c   : > { %726 = vst [vmem:[#allocation2 + $0x38] sm:$0xff] %v1447_v27 }
 0x11d   : > { %724 = vst [vmem:[#allocation2 + $0x28] sm:$0xff] %v1145_v31 }
 0x11e PF: > { %p727_p8 = scmp.gt.s32.totalorder %s1240_s9, 0 }
 0x120   : > { %p729_p9 = pnand %p727_p8, %p158_p6 }
 0x121   : > { %v733_v32 = vld [vmem:[#allocation2] sm:$0xff] (!%p729_p9)  ;;  %v734_v33 = vld [vmem:[#allocation2 + $0x8] sm:$0xff] (!%p729_p9)  ;;  %v735_v34 = vld [vmem:[#allocation2 + $0x10] sm:$0xff] (!%p729_p9) }
 0x122   : > { %732 = sbr.rel (%p729_p9) target bundleno = 297 (0x129), region = 36  ;;  %v741_v35 = vadd.f32 (!%p729_p9), %v1139_v17, %v733_v32  ;;  %v742_v36 = vadd.f32 (!%p729_p9), %v1141_v20, %v734_v33  ;;  %v743_v37 = vadd.f32 (!%p729_p9), %v1443_v14, %v735_v34  ;;  %v736_v38 = vld [vmem:[#allocation2 + $0x18] sm:$0xff] (!%p729_p9) }
 0x123   : > { %v744_v39 = vadd.f32 (!%p729_p9), %v1140_v16, %v736_v38  ;;  %v739_v42 = vld [vmem:[#allocation2 + $0x30] sm:$0xff] (!%p729_p9) }
 0x124   : > { %v737_v25 = vld [vmem:[#allocation2 + $0x20] sm:$0xff] (!%p729_p9)  ;;  %v738_v26 = vld [vmem:[#allocation2 + $0x28] sm:$0xff] (!%p729_p9)  ;;  %749 = vst [vmem:[#allocation2] sm:$0xff] (!%p729_p9), %v741_v35  ;;  %750 = vst [vmem:[#allocation2 + $0x8] sm:$0xff] (!%p729_p9), %v742_v36  ;;  %v747_v45 = vadd.f32 (!%p729_p9), %v1445_v53, %v739_v42 }
 0x125   : > { %v745_v40 = vadd.f32 (!%p729_p9), %v1143_v22, %v737_v25  ;;  %v746_v41 = vadd.f32 (!%p729_p9), %v1145_v31, %v738_v26  ;;  %v740_v43 = vld [vmem:[#allocation2 + $0x38] sm:$0xff] (!%p729_p9)  ;;  %751 = vst [vmem:[#allocation2 + $0x10] sm:$0xff] (!%p729_p9), %v743_v37  ;;  %752 = vst [vmem:[#allocation2 + $0x18] sm:$0xff] (!%p729_p9), %v744_v39 }
 0x126   : > { %v748_v46 = vadd.f32 (!%p729_p9), %v1447_v27, %v740_v43  ;;  %755 = vst [vmem:[#allocation2 + $0x30] sm:$0xff] (!%p729_p9), %v747_v45 }
 0x127   : > { %753 = vst [vmem:[#allocation2 + $0x20] sm:$0xff] (!%p729_p9), %v745_v40  ;;  %754 = vst [vmem:[#allocation2 + $0x28] sm:$0xff] (!%p729_p9), %v746_v41 }
 0x128   : > { %756 = vst [vmem:[#allocation2 + $0x38] sm:$0xff] (!%p729_p9), %v748_v46 }
 0x129 PF: > { %p1031_p10 = scmp.ne.s32.totalorder %s1240_s9, 3 }
 0x12b   : > { %760 = sbr.rel (%p1031_p10) target bundleno = 361 (0x169), region = 40  ;;  %v761_v47 = vld [vmem:[#allocation2] sm:$0xff] (!%p1031_p10)  ;;  %v762_v48 = vld [vmem:[#allocation2 + $0x8] sm:$0xff] (!%p1031_p10) }
 0x12c   : > { %v763_v49 = vld [vmem:[#allocation2 + $0x10] sm:$0xff] (!%p1031_p10)  ;;  %v764_v29 = vld [vmem:[#allocation2 + $0x18] sm:$0xff] (!%p1031_p10)  ;;  %v769_v51 = vadd.f32 (!%p1031_p10), %v1139_v17, %v761_v47  ;;  %v770_v52 = vadd.f32 (!%p1031_p10), %v1141_v20, %v762_v48 }
 0x12d   : > { %v771_v54 = vadd.f32 (!%p1031_p10), %v1443_v14, %v763_v49  ;;  %v772_v55 = vadd.f32 (!%p1031_p10), %v1140_v16, %v764_v29  ;;  %v767_v60 = vld [vmem:[#allocation2 + $0x30] sm:$0xff] (!%p1031_p10) }
 0x12e   : > { %v765_v50 = vld [vmem:[#allocation2 + $0x20] sm:$0xff] (!%p1031_p10)  ;;  %v766_v56 = vld [vmem:[#allocation2 + $0x28] sm:$0xff] (!%p1031_p10)  ;;  %v777_v30 = vadd.f32 (!%p1031_p10), %v770_v52, %v769_v51  ;;  %v790_v57 = vmul.f32 (!%p1031_p10), %v769_v51, %v769_v51  ;;  %v791_v59 = vmul.f32 (!%p1031_p10), %v770_v52, %v770_v52  ;;  %v775_v44 = vadd.f32 (!%p1031_p10), %v1445_v53, %v767_v60 }
 0x12f   : > { %v773_v58 = vadd.f32 (!%p1031_p10), %v1143_v22, %v765_v50  ;;  %v792_v12 = vmul.f32 (!%p1031_p10), %v771_v54, %v771_v54  ;;  %v774_v62 = vadd.f32 (!%p1031_p10), %v1145_v31, %v766_v56  ;;  %v793_v63 = vmul.f32 (!%p1031_p10), %v772_v55, %v772_v55  ;;  %v768_v1 = vld [vmem:[#allocation2 + $0x38] sm:$0xff] (!%p1031_p10) }
 0x130   : > { %v778_v61 = vadd.f32 (!%p1031_p10), %v777_v30, %v771_v54  ;;  %v798_v0 = vadd.f32 (!%p1031_p10), %v791_v59, %v790_v57  ;;  %v776_v4 = vadd.f32 (!%p1031_p10), %v1447_v27, %v768_v1  ;;  %v796_v13 = vmul.f32 (!%p1031_p10), %v775_v44, %v775_v44 }
 0x131   : > { %v794_v6 = vmul.f32 (!%p1031_p10), %v773_v58, %v773_v58  ;;  %v795_v5 = vmul.f32 (!%p1031_p10), %v774_v62, %v774_v62 }
 0x132   : > { %v779_v2 = vadd.f32 %v778_v61, %v772_v55  ;;  %v799_v23 = vadd.f32 %v798_v0, %v792_v12  ;;  %v797_v14 = vmul.f32 %v776_v4, %v776_v4 }
 0x134   : > { %v780_v3 = vadd.f32 %v779_v2, %v773_v58  ;;  %v800_v9 = vadd.f32 %v799_v23, %v793_v63 }
 0x136   : > { %v781_v10 = vadd.f32 %v780_v3, %v774_v62  ;;  %v801_v7 = vadd.f32 %v800_v9, %v794_v6 }
 0x138   : > { %v782_v8 = vadd.f32 %v781_v10, %v775_v44  ;;  %v802_v11 = vadd.f32 %v801_v7, %v795_v5 }
 0x13a   : > { %v783_v17 = vadd.f32 %v782_v8, %v776_v4  ;;  %v803_v15 = vadd.f32 %v802_v11, %v796_v13 }
 0x13c   : > { %v784_v16 = vrot.slane %v783_v17, 4  ;;  %v804_v19 = vadd.f32 %v803_v15, %v797_v14 }
 0x13e   : > { %v785_v20 = vadd.f32 %v784_v16, %v783_v17  ;;  %v805_v18 = vrot.slane %v804_v19, 4 }
 0x140   : > { %v786_v53 = vrot.slane %v785_v20, 2  ;;  %v806_v21 = vadd.f32 %v805_v18, %v804_v19 }
 0x142   : > { %v787_v22 = vadd.f32 %v786_v53, %v785_v20  ;;  %v807_v24 = vrot.slane %v806_v21, 2 }
 0x144   : > { %v788_v28 = vrot.slane %v787_v22, 1  ;;  %v808_v27 = vadd.f32 %v807_v24, %v806_v21 }
 0x146   : > { %v789_v31 = vadd.f32 %v788_v28, %v787_v22  ;;  %v809_v32 = vrot.slane %v808_v27, 1 }
 0x148   : > { %v811_v33 = vmul.f32 0.015625, %v789_v31  ;;  %v810_v34 = vadd.f32 %v809_v32, %v808_v27 }
 0x14a   : > { %v813_v35 = vmul.f32 %v811_v33, %v811_v33  ;;  %v812_v36 = vmul.f32 0.015625, %v810_v34  ;;  %v816_v26 = vsub.f32 %v769_v51, %v811_v33  ;;  %v817_v39 = vsub.f32 %v770_v52, %v811_v33 }
 0x14b   : > { %v818_v40 = vsub.f32 %v771_v54, %v811_v33  ;;  %v819_v41 = vsub.f32 %v772_v55, %v811_v33  ;;  %v820_v42 = vsub.f32 %v773_v58, %v811_v33  ;;  %v821_v43 = vsub.f32 %v774_v62, %v811_v33 }
 0x14c   : > { %v814_v37 = vsub.f32 %v812_v36, %v813_v35  ;;  %v822_v45 = vsub.f32 %v775_v44, %v811_v33  ;;  %v823_v46 = vsub.f32 %v776_v4, %v811_v33 }
 0x14e   : > { %v815_v38 = vmax.f32 %v814_v37, 0.0 }
 0x150   : > { %v824_v25 = vadd.f32 1e-05, %v815_v38 }
 0x152   : > { %1216 = vrsqrt.f32 %v824_v25 }
 0x15c   : > { %v1217_v47 = vpop.eup %1216 }
 0x15d   : > { %v826_v48 = vmul.f32 %v1217_v47, %v816_v26  ;;  %v827_v49 = vmul.f32 %v1217_v47, %v817_v39  ;;  %v828_v29 = vmul.f32 %v1217_v47, %v818_v40  ;;  %v829_v50 = vmul.f32 %v1217_v47, %v819_v41 }
 0x15e   : > { %v830_v56 = vmul.f32 %v1217_v47, %v820_v42  ;;  %v831_v30 = vmul.f32 %v1217_v47, %v821_v43  ;;  %v832_v57 = vmul.f32 %v1217_v47, %v822_v45  ;;  %v833_v59 = vmul.f32 %v1217_v47, %v823_v46 }
 0x15f   : > { %v834_v12 = vmul.f32 0.2, %v826_v48  ;;  %v835_v60 = vmul.f32 0.2, %v827_v49  ;;  %v836_v61 = vmul.f32 0.2, %v828_v29 }
 0x160   : > { %v837_v51 = vmul.f32 0.2, %v829_v50  ;;  %v838_v52 = vmul.f32 0.2, %v830_v56  ;;  %v839_v54 = vmul.f32 0.2, %v831_v30 }
 0x161   : > { %v842_v55 = vmax.f32 %v826_v48, %v834_v12  ;;  %v843_v58 = vmax.f32 %v827_v49, %v835_v60  ;;  %v844_v62 = vmax.f32 %v828_v29, %v836_v61  ;;  %v840_v63 = vmul.f32 0.2, %v832_v57 }
 0x162   : > { %v845_v0 = vmax.f32 %v829_v50, %v837_v51  ;;  %v846_v1 = vmax.f32 %v830_v56, %v838_v52  ;;  %v847_v2 = vmax.f32 %v831_v30, %v839_v54  ;;  %v841_v44 = vmul.f32 0.2, %v833_v59 }
 0x163   : > { %v1058_v6 = vpack.c.bf16 %v843_v58, %v842_v55  ;;  %v848_v23 = vmax.f32 %v832_v57, %v840_v63 }
 0x164   : > { %v1063_v3 = vpack.c.bf16 %v845_v0, %v844_v62  ;;  %v1068_v4 = vpack.c.bf16 %v847_v2, %v846_v1  ;;  %v849_v5 = vmax.f32 %v833_v59, %v841_v44 }
 0x165   : > { %1059 = vst [vmem:[%s1320_s26] sm:$0xff] %v1058_v6  }
 0x166   : > { %1075 = vst [vmem:[%s1320_s26 + $0x8] sm:$0xff] %v1063_v3   ;;  %1076 = vst [vmem:[%s1320_s26 + $0x10] sm:$0xff] %v1068_v4   ;;  %v1073_v9 = vpack.c.bf16 %v849_v5, %v848_v23 }
 0x168   : > { %1077 = vst [vmem:[%s1320_s26 + $0x18] sm:$0xff] %v1073_v9  }
 0x169 PF: > { %s12_s13 = sadd.s32 1, %s1256_s13   ;;  %s1487_s9 = smov %s1248_s11 }
 0x16a   : > { %p9_p11 = scmp.ge.s32.totalorder %s12_s13, 10   ;;  %s1488_s10 = smov %s1252_s12 }
 0x16b   : > { %s1489_s11 = smov %s1492_s14  ;;  %s1490_s12 = smov %s1496_s15 }
 0x16c   :  { %11 = sbr.rel (!%p9_p11) target bundleno = 3 (0x3), region = 74 }

</bundles_post_ra>
